<compile_context>
chip_gen: v6e
topology: v6e:2x2x1
jax: 0.10.0
libtpu: 0.0.40
codegen_flags: <defaults>
</compile_context>

<pallas_src>
import functools

import numpy as np

import jax
import jax.numpy as jnp
from jax import lax
from jax.experimental import pallas as pl
from jax.experimental.pallas import tpu as pltpu

# ----------------------------------------------------------------------------- config
INPUT_IMG_SIZE = (64, 64)          # must be divisible by 32 (like the torch module)
N_CLASSES = 2
IN_CHANNELS = 3
CIN_PAD = 16                       # first-layer input channels zero-padded 3 -> 16
# Scaled-down VGG16 "features[:-1]": ints = conv3x3(out_ch)+ReLU, "M" = maxpool2x2.
# Channel widths are multiples of 16 so bf16 sublane tiles stay aligned.
VGG_CFG = [16, 16, "M", 16, 16, "M", 32, 32, 32, "M", 64, 64, 64, "M", 64, 64, 64]
N_CONV = sum(1 for v in VGG_CFG if v != "M")
MAX_COUT = max(v for v in VGG_CFG if v != "M")      # 64
MAX_KIN = 9 * MAX_COUT                              # 576

TAPS = tuple((dy, dx) for dy in (-1, 0, 1) for dx in (-1, 0, 1))

_ROLL_CONV_MIN = 128   # packed spatial lanes >= this -> roll-based im2col
_ROLL_POOL_MIN = 256   # packed spatial lanes >= this -> roll-based 2x2 max pool


# ------------------------------------------------------------- roll direction probing
@functools.lru_cache(maxsize=None)
def _roll_like_jnp() -> bool:
    """Pin pltpu.roll's rotation convention once, on the same (default) backend the
    main kernel compiles for.  Cached: costs one trivial compile on first use only."""

    def probe(x_ref, o_ref):
        o_ref[...] = pltpu.roll(x_ref[...], shift=1, axis=1)

    x = jnp.arange(8 * 128, dtype=jnp.float32).reshape(8, 128)
    y = pl.pallas_call(
        probe,
        out_shape=jax.ShapeDtypeStruct((8, 128), jnp.float32),
        in_specs=[pl.BlockSpec(memory_space=pltpu.MemorySpace.VMEM)],
        out_specs=pl.BlockSpec(memory_space=pltpu.MemorySpace.VMEM),
    )(x)
    return bool(jnp.array_equal(y, jnp.roll(x, 1, axis=1)))


# ------------------------------------------------------------------ in-kernel helpers
def _tap_masks(h, w, n):
    """Boundary masks for the 8 non-center 3x3 taps, built ONCE per spatial stage and
    reused by every conv of that stage.  Packed layout: lane = b*h*w + y*w + x."""
    li = lax.broadcasted_iota(jnp.int32, (1, n), 1)
    col = li % w
    row = (li // w) % h
    masks = []
    for dy, dx in TAPS:
        if dy == 0 and dx == 0:
            masks.append(None)
        else:
            masks.append((col + dx >= 0) & (col + dx < w)
                         & (row + dy >= 0) & (row + dy < h))
    return masks


def _compact_even_blocks(v, g, take, shift_fn):
    """Keep lanes whose block index (lane // g) is even, packed contiguously to the
    front (order preserved); return the first `take` (= N//2) lanes.
    Log-step roll/select butterfly; requires N // (2*g) to be a power of two."""
    n = v.shape[-1]
    steps = int(round(np.log2(n // (2 * g))))
    idx = lax.broadcasted_iota(jnp.int32, (1, n), 1)
    for j in range(1, steps + 1):
        step = g * (1 << (j - 1))
        m = idx % (4 * step)
        recv = (m >= step) & (m < 2 * step)
        v = jnp.where(recv, shift_fn(v, step), v)
    return v[:, :take]


def _maxpool2x2_roll(act, w, shift_fn):
    """2x2/stride-2 max pool on a (C, bt*h*w) raster-flattened bf16 activation.
    Coarse (even rows, g=w) compaction runs first on full data; fine (even cols, g=1)
    compaction runs second on half the data."""
    n = act.shape[-1]
    m = jnp.maximum(act, shift_fn(act, w))               # vertical pair max
    m = _compact_even_blocks(m, w, n // 2, shift_fn)     # keep even rows
    m = jnp.maximum(m, shift_fn(m, 1))                   # horizontal pair max
    m = _compact_even_blocks(m, 1, n // 4, shift_fn)     # keep even columns
    return m


def _maxpool2x2_mat(act, shift_ref, sel_ref):
    """2x2/stride-2 max pool for tiny packed spatial sizes via host matrices
    (shift_ref: (3, n, n) bf16 for taps (0,1),(1,0),(1,1); sel_ref: (n, n//4) bf16)."""
    m = act
    for t in range(3):
        piece = jnp.dot(act, shift_ref[t],
                        preferred_element_type=jnp.float32).astype(act.dtype)
        m = jnp.maximum(m, piece)
    return jnp.dot(m, sel_ref[...],
                   preferred_element_type=jnp.float32).astype(act.dtype)


def _conv3x3_relu(act, w2, bias, masks, mats_ref, w, shift_fn):
    """Fused 3x3 conv (padding=1) + bias + ReLU, transposed lane-dense layout.
    act: (Cin, n) bf16; w2: (Cout, 9*Cin) bf16; bias: (Cout, 1) f32.
    The 9 taps are stacked along the contraction axis -> a single fat-K MXU matmul."""
    pieces = []
    for o, (dy, dx) in enumerate(TAPS):
        if dy == 0 and dx == 0:
            piece = act
        elif masks is not None:        # roll-based im2col (large stages)
            piece = jnp.where(masks[o], shift_fn(act, dy * w + dx),
                              jnp.zeros((), act.dtype))
        else:                          # host shift matrices (tiny stages)
            mi = o if o < 4 else o - 1
            piece = jnp.dot(act, mats_ref[mi],
                            preferred_element_type=jnp.float32).astype(act.dtype)
        pieces.append(piece)
    patch = jnp.concatenate(pieces, axis=0)                        # (9*Cin, n) bf16
    y = jnp.dot(w2, patch, preferred_element_type=jnp.float32)     # (Cout, n) f32
    return jnp.maximum(y + bias, 0.0).astype(jnp.bfloat16)


# ---------------------------------------------------------------- host-side matrices
def _bilinear_matrix(out_size, in_size):
    """PyTorch F.interpolate(mode='bilinear', align_corners=False) as (out,in) matrix."""
    scale = in_size / out_size
    i = np.arange(out_size, dtype=np.float64)
    src = np.maximum(scale * (i + 0.5) - 0.5, 0.0)
    i0 = np.minimum(np.floor(src).astype(np.int64), in_size - 1)
    i1 = np.minimum(i0 + 1, in_size - 1)
    lam = (src - i0).astype(np.float32)
    m = np.zeros((out_size, in_size), dtype=np.float32)
    m[np.arange(out_size), i0] += 1.0 - lam
    m[np.arange(out_size), i1] += lam
    return m


def _shift_matrix_np(h, w, dy, dx):
    """(S,S): act @ M == zero-padded spatial shift of a (C, S) activation by (dy,dx)."""
    s = h * w
    m = np.zeros((s, s), np.float32)
    for y in range(h):
        for x in range(w):
            yy, xx = y + dy, x + dx
            if 0 <= yy < h and 0 <= xx < w:
                m[yy * w + xx, y * w + x] = 1.0
    return m


def _pool_select_np(h, w):
    """(S, S//4) 0/1 matrix selecting the top-left corner of every 2x2 block."""
    s, w2 = h * w, w // 2
    out = np.zeros((s, s // 4), np.float32)
    for ty in range(h // 2):
        for tx in range(w2):
            out[(2 * ty) * w + 2 * tx, ty * w2 + tx] = 1.0
    return out


def _head_sum_np(bt, hf, wf):
    """(bt*hf*wf, bt): per-image average over the 2x2-maxpool anchors (fuses the
    head AvgPool and the per-image segmented sum into one small matmul)."""
    s = hf * wf
    out = np.zeros((bt * s, bt), np.float32)
    scale = 1.0 / ((hf // 2) * (wf // 2))
    for b in range(bt):
        for ty in range(hf // 2):
            for tx in range(wf // 2):
                out[b * s + (2 * ty) * wf + 2 * tx, b] = scale
    return out


def _pack_conv_params(convs):
    """HWIO (3,3,Cin,Cout) weights -> one (13, 64, 576) bf16 blob laid out as
    (Cout, 9*Cin) with tap-major contraction rows; biases -> (13, 64, 1) f32 blob."""
    w_blob = np.zeros((N_CONV, MAX_COUT, MAX_KIN), np.float32)
    b_blob = np.zeros((N_CONV, MAX_COUT, 1), np.float32)
    for li, (w, bb) in enumerate(convs):
        w = np.asarray(w, np.float32)
        bb = np.asarray(bb, np.float32)
        if li == 0 and w.shape[2] < CIN_PAD:
            w = np.pad(w, ((0, 0), (0, 0), (0, CIN_PAD - w.shape[2]), (0, 0)))
        cin, cout = w.shape[2], w.shape[3]
        w2 = np.transpose(w, (3, 0, 1, 2)).reshape(cout, 9 * cin)
        w_blob[li, :cout, :9 * cin] = w2
        b_blob[li, :cout, 0] = bb
    return jnp.asarray(w_blob, jnp.bfloat16), jnp.asarray(b_blob, jnp.float32)


# ---------------------------------------------------------------------- model params
def init_params(key):
    convs = []
    cin = IN_CHANNELS
    for v in VGG_CFG:
        if v == "M":
            continue
        key, kw, kb = jax.random.split(key, 3)
        fan_in = 9 * cin
        w = jax.random.normal(kw, (3, 3, cin, v), jnp.float32) * np.sqrt(2.0 / fan_in)
        b = 0.01 * jax.random.normal(kb, (v,), jnp.float32)
        convs.append((w, b))
        cin = v
    key, kw, kb = jax.random.split(key, 3)
    w_lin = jax.random.normal(kw, (N_CLASSES, cin), jnp.float32) / np.sqrt(cin)
    b_lin = 0.01 * jax.random.normal(kb, (N_CLASSES,), jnp.float32)
    return {"convs": convs, "linear": (w_lin, b_lin)}


# --------------------------------------------------------------------- fused forward
def custom_vgg_forward(x_nchw, params, bt=None):
    """Eval-mode forward: returns (probs, norm_location) like the torch module."""
    like_jnp = _roll_like_jnp()

    b = x_nchw.shape[0]
    h0, w0 = INPUT_IMG_SIZE
    s0 = h0 * w0
    if bt is None:
        bt = 1
        for cand in (2, 4):
            if b % cand == 0:
                bt = cand
    assert b % bt == 0 and (bt & (bt - 1)) == 0
    steps = b // bt
    n0 = bt * s0

    # ---- pack input: (B, 3, H, W) -> (steps, CIN_PAD, bt*H*W) bf16, image-major ----
    x = x_nchw.astype(jnp.float32)
    x = jnp.pad(x, ((0, 0), (0, CIN_PAD - IN_CHANNELS), (0, 0), (0, 0)))
    x = x.reshape(b, CIN_PAD, s0).reshape(steps, bt, CIN_PAD, s0)
    x = x.transpose(0, 2, 1, 3).reshape(steps, CIN_PAD, n0).astype(jnp.bfloat16)

    # ---- weight / bias blobs, linear head ----
    w_blob, b_blob = _pack_conv_params(params["convs"])
    w_lin, b_lin = params["linear"]
    w_lin = jnp.asarray(w_lin, jnp.float32)
    b_lin = jnp.asarray(b_lin, jnp.float32).reshape(N_CLASSES, 1)

    # ---- host-precomputed matrices (head pool, upsample, tiny-stage helpers) ----
    hf, wf = h0 // 16, w0 // 16
    eye_bt = np.eye(bt, dtype=np.float32)
    head_shift = np.stack([np.kron(eye_bt, _shift_matrix_np(hf, wf, dy, dx))
                           for dy, dx in ((0, 1), (1, 0), (1, 1))])
    head_sum = _head_sum_np(bt, hf, wf)
    upmat = np.kron(eye_bt, np.kron(_bilinear_matrix(h0, hf),
                                    _bilinear_matrix(w0, wf)).T)

    extras = []
    conv_mat_idx = {}
    pool_mat_idx = {}
    h, w = h0, w0
    for v in VGG_CFG:
        n = bt * h * w
        if v == "M":
            if n < _ROLL_POOL_MIN and (h, w) not in pool_mat_idx:
                shifts = np.stack([np.kron(eye_bt, _shift_matrix_np(h, w, dy, dx))
                                   for dy, dx in ((0, 1), (1, 0), (1, 1))])
                sel = np.kron(eye_bt, _pool_select_np(h, w))
                pool_mat_idx[(h, w)] = len(extras)
                extras.append(jnp.asarray(shifts, jnp.bfloat16))
                extras.append(jnp.asarray(sel, jnp.bfloat16))
            h //= 2
            w //= 2
        else:
            if n < _ROLL_CONV_MIN and (h, w) not in conv_mat_idx:
                mats = np.stack([np.kron(eye_bt, _shift_matrix_np(h, w, dy, dx))
                                 for dy, dx in TAPS if (dy, dx) != (0, 0)])
                conv_mat_idx[(h, w)] = len(extras)
                extras.append(jnp.asarray(mats, jnp.bfloat16))

    n_fixed = 8

    # ------------------------------------------------------------- the fused kernel
    def kernel(*refs):
        (x_ref, wblob_ref, bblob_ref, wlin_ref, blin_ref,
         up_ref, hshift_ref, hsum_ref) = refs[:n_fixed]
        ex = refs[n_fixed:-2]
        probs_ref, norm_ref = refs[-2], refs[-1]

        def shift_fn(val, delta):
            """result[:, t] = val[:, (t + delta) % n] (lane rotation, static delta)."""
            nn = val.shape[-1]
            d = delta % nn
            if d == 0:
                return val
            return pltpu.roll(val, shift=(nn - d) if like_jnp else d, axis=1)

        # ---- VGG feature extractor: entirely VMEM resident, bf16 ----
        act = x_ref[0]                                   # (CIN_PAD, bt*s0) bf16
        hh, ww = h0, w0
        cin = CIN_PAD
        li = 0
        masks = None
        mask_hw = None
        for v in VGG_CFG:
            n = bt * hh * ww
            if v == "M":
                if n >= _ROLL_POOL_MIN:
                    act = _maxpool2x2_roll(act, ww, shift_fn)
                else:
                    base = pool_mat_idx[(hh, ww)]
                    act = _maxpool2x2_mat(act, ex[base], ex[base + 1])
                hh //= 2
                ww //= 2
            else:
                cout = v
                if n >= _ROLL_CONV_MIN:
                    if mask_hw != (hh, ww):              # hoisted once per stage
                        masks = _tap_masks(hh, ww, n)
                        mask_hw = (hh, ww)
                    mats_ref = None
                else:
                    masks = None
                    mats_ref = ex[conv_mat_idx[(hh, ww)]]
                w2 = wblob_ref[li, :cout, :9 * cin]      # (Cout, 9*Cin) bf16
                bias = bblob_ref[li, :cout, :]           # (Cout, 1) f32
                act = _conv3x3_relu(act, w2, bias, masks, mats_ref, ww, shift_fn)
                cin = cout
                li += 1

        # ---- classification head (f32): MaxPool2x2 -> AvgPool -> Linear -> softmax --
        fm = act.astype(jnp.float32)                     # (Cf, bt*16)
        mp = fm
        for t in range(3):
            mp = jnp.maximum(mp, jnp.dot(fm, hshift_ref[t],
                                         preferred_element_type=jnp.float32))
        pooled = jnp.dot(mp, hsum_ref[...],
                         preferred_element_type=jnp.float32)        # (Cf, bt)
        scores = jnp.dot(wlin_ref[...], pooled,
                         preferred_element_type=jnp.float32) + blin_ref[...]
        smax = jnp.max(scores, axis=0, keepdims=True)
        e = jnp.exp(scores - smax)
        probs_ref[0] = e / jnp.sum(e, axis=0, keepdims=True)         # (K, bt)

        # ---- CAM: project, bilinear upsample, per-image min/max normalization ----
        loc = jnp.dot(wlin_ref[...], fm,
                      preferred_element_type=jnp.float32)            # (K, bt*16)
        up = jnp.dot(loc, up_ref[...],
                     preferred_element_type=jnp.float32)             # (K, bt*s0)
        chunks = []
        for bi in range(bt):
            chunk = up[:, bi * s0:(bi + 1) * s0]
            mx = jnp.max(chunk, axis=1, keepdims=True)
            mn = jnp.min(chunk, axis=1, keepdims=True)
            den = mx - mn
            safe = jnp.where(den > 0.0, den, 1.0)
            chunks.append(jnp.where(den > 0.0, (chunk - mn) / safe, 0.0))
        norm_ref[0] = chunks[0] if bt == 1 else jnp.concatenate(chunks, axis=1)

    # -------------------------------------------------------------- specs & launch
    def _const_spec(arr):
        nd = arr.ndim

        def idx_map(i):
            return (0,) * nd

        return pl.BlockSpec(arr.shape, idx_map)

    fixed_inputs = [x, w_blob, b_blob, w_lin, b_lin,
                    jnp.asarray(upmat, jnp.float32),
                    jnp.asarray(head_shift, jnp.float32),
                    jnp.asarray(head_sum, jnp.float32)]
    in_specs = [pl.BlockSpec((1, CIN_PAD, n0), lambda i: (i, 0, 0))]
    in_specs += [_const_spec(a) for a in fixed_inputs[1:]]
    in_specs += [_const_spec(a) for a in extras]

    out_shapes = (jax.ShapeDtypeStruct((steps, N_CLASSES, bt), jnp.float32),
                  jax.ShapeDtypeStruct((steps, N_CLASSES, n0), jnp.float32))
    out_specs = (pl.BlockSpec((1, N_CLASSES, bt), lambda i: (i, 0, 0)),
                 pl.BlockSpec((1, N_CLASSES, n0), lambda i: (i, 0, 0)))

    probs_pk, norm_pk = pl.pallas_call(
        kernel,
        out_shape=out_shapes,
        grid=(steps,),
        in_specs=in_specs,
        out_specs=out_specs,
        compiler_params=pltpu.CompilerParams(
            # TODO(synk): on v7x with steps >= 2, pltpu.CORE_PARALLEL on this axis
            # would split grid steps across the two TensorCores.
            dimension_semantics=("parallel",),
            vmem_limit_bytes=32 * 1024 * 1024,
        ),
    )(*(fixed_inputs + extras))

    probs = probs_pk.transpose(0, 2, 1).reshape(b, N_CLASSES)
    norm = norm_pk.reshape(steps, N_CLASSES, bt, s0).transpose(0, 2, 1, 3)
    norm = norm.reshape(b, N_CLASSES, h0, w0)
    return probs, norm


# ---------------------------------------------------------------- pure-JAX reference
def reference_forward(x_nchw, params):
    prec = lax.Precision.HIGHEST
    x = jnp.transpose(x_nchw, (0, 2, 3, 1)).astype(jnp.float32)   # NHWC
    ci = 0
    for v in VGG_CFG:
        if v == "M":
            x = lax.reduce_window(x, -jnp.inf, lax.max,
                                  (1, 2, 2, 1), (1, 2, 2, 1), "VALID")
        else:
            w, bb = params["convs"][ci]
            x = lax.conv_general_dilated(
                x, w, window_strides=(1, 1), padding="SAME",
                dimension_numbers=("NHWC", "HWIO", "NHWC"), precision=prec) + bb
            x = jnp.maximum(x, 0.0)
            ci += 1
    fm = x                                                        # (B, 4, 4, C)
    p = lax.reduce_window(fm, -jnp.inf, lax.max, (1, 2, 2, 1), (1, 2, 2, 1), "VALID")
    pooled = jnp.mean(p, axis=(1, 2))
    w_lin, b_lin = params["linear"]
    scores = jnp.dot(pooled, w_lin.T, precision=prec) + b_lin
    probs = jax.nn.softmax(scores, axis=-1)

    loc = jnp.einsum("bhwc,kc->bkhw", fm, w_lin, precision=prec)
    mh = jnp.asarray(_bilinear_matrix(INPUT_IMG_SIZE[0], fm.shape[1]))
    mw = jnp.asarray(_bilinear_matrix(INPUT_IMG_SIZE[1], fm.shape[2]))
    up = jnp.einsum("Yy,bkyx,Xx->bkYX", mh, loc, mw, precision=prec)
    mx = jnp.max(up, axis=(-2, -1), keepdims=True)
    mn = jnp.min(up, axis=(-2, -1), keepdims=True)
    denom = mx - mn
    safe = jnp.where(denom > 0, denom, 1.0)
    norm = jnp.where(denom > 0, (up - mn) / safe, 0.0)
    return probs, norm


# --------------------------------------------------------------------------------- main
if __name__ == "__main__":
    key = jax.random.PRNGKey(0)
    key, kx = jax.random.split(key)
    x = jax.random.normal(kx, (2, IN_CHANNELS, *INPUT_IMG_SIZE), jnp.float32)  # NCHW

    params = init_params(key)

    probs, norm_loc = custom_vgg_forward(x, params)
    probs = jax.block_until_ready(probs)
    norm_loc = jax.block_until_ready(norm_loc)

    assert probs.shape == (2, N_CLASSES)
    assert norm_loc.shape == (2, N_CLASSES, *INPUT_IMG_SIZE)
    assert bool(jnp.all(jnp.isfinite(probs)))
    assert bool(jnp.all(jnp.isfinite(norm_loc)))
    assert bool(jnp.allclose(jnp.sum(probs, axis=-1), 1.0, atol=1e-5))

    # Correctness vs. a pure-JAX (XLA, f32/HIGHEST) reference of the same module.
    # Tolerances account for the bf16 MXU path through 13 conv layers.
    probs_ref, norm_ref = reference_forward(x, params)
    assert bool(jnp.max(jnp.abs(probs - probs_ref)) < 2e-2)
    assert bool(jnp.max(jnp.abs(norm_loc - norm_ref)) < 6e-2)

    print("KERNEL_OK")
</pallas_src>

<mosaic_0001>
module attributes {stable_mosaic.version = 11 : i64} {
  func.func @probe(%arg0: memref<8x128xf32, #tpu.memory_space<vmem>>, %arg1: memref<8x128xf32, #tpu.memory_space<vmem>>) attributes {dimension_semantics = [], scalar_prefetch = 0 : i64, scratch_operands = 0 : i64, tpu.core_type = #tpu.core_type<tc>} {
    %c0 = arith.constant 0 : index
    %c0_0 = arith.constant 0 : index
    %0 = vector.load %arg0[%c0, %c0_0] : memref<8x128xf32, #tpu.memory_space<vmem>>, vector<8x128xf32>
    %c1_i32 = arith.constant 1 : i32
    %1 = tpu.dynamic_rotate %0 by %c1_i32 dim 1 : vector<8x128xf32>, i32 -> vector<8x128xf32>
    %c0_1 = arith.constant 0 : index
    %c0_2 = arith.constant 0 : index
    %2 = vector.load %arg1[%c0_1, %c0_2] : memref<8x128xf32, #tpu.memory_space<vmem>>, vector<8x128xf32>
    tpu.vector_store %arg1[%c0_1, %c0_2], %1 {strides = array<i32>} : memref<8x128xf32, #tpu.memory_space<vmem>>, vector<8x128xf32>,
    return
  }
}

</mosaic_0001>

<bundles_post_ra>
// kernel: tpu_custom_call.1
= control target key start
LH: loop header
LB: loop body
LE: loop exit
PB: predicated region body
PF: predicated region fallthrough
CT: control target
= control target key end

     0   :  { %6 = vsyncpa [#allocation3], 0  ;;  %s106_s0 = inlined_call_operand.hbm [shape: f32[8,128], index: 0, kind: input, shape index: {}]   ;;  %s107_s1 = inlined_call_operand.hbm [shape: f32[8,128], index: 1, kind: output, shape index: {}]  }
   0x1   :  { %7 = vsyncpa [#allocation4], 0  ;;  %s87_s6 = smov [#allocation2]  }
   0x2   :  { %s14_s7 = sshll.u32 %s87_s6, 4  ;;  %s15_s7 = int_to_ptr.vmem [resolvable:$true] %s14_s7 }
   0x3   :  { %s51_s8 = scalar_lea.vmem %s15_s7, 128  ;;  %p56_p1 = scmp.lt.s32.totalorder %s15_s7, %s15_s7 }
   0x4   :  { %p52_p0 = scmp.ne.s32.totalorder %s15_s7, %s51_s8  ;;  %p57_p2 = scmp.lt.s32.totalorder %s51_s8, %s51_s8 }
   0x6   :  { %p58_p3 = por %p57_p2, %p56_p1 }
   0x8   :  { %p59_p4 = pnand %p58_p3, %p52_p0 }
   0xa   :  { %62 = shalt.err (!%p59_p4)
}
   0xb   :  { %17 = dma.hbm_to_vmem [thread:$0]  %s106_s0, 128, %s15_s7, [#allocation3]  }
   0xc   :  { %83 = dma.done.wait [#allocation3], 128  }
   0xd   :  { %84 = vsyncadd [#allocation3], 4294967168  ;;  %v21_v0 = vld [vmem:[#allocation2] sm:$0xff]  ;;  %s88_s11 = smov 1   ;;  %s89_s12 = smov [#allocation5]  }
   0xe   :  { %22 = vrot.lane.b32.xlu0 %v21_v0, %s88_s11  ;;  %s31_s13 = sshll.u32 %s89_s12, 4  ;;  %s32_s13 = int_to_ptr.vmem [resolvable:$true] %s31_s13 }
   0xf   :  { %s63_s14 = scalar_lea.vmem %s32_s13, 128  ;;  %p68_p6 = scmp.lt.s32.totalorder %s32_s13, %s32_s13 }
  0x10   :  { %p64_p5 = scmp.ne.s32.totalorder %s32_s13, %s63_s14  ;;  %p69_p7 = scmp.lt.s32.totalorder %s63_s14, %s63_s14 }
  0x12   :  { %p70_p8 = por %p69_p7, %p68_p6 }
  0x14   :  { %p71_p9 = pnand %p70_p8, %p64_p5 }
  0x80   :  { %v23_v1 = vpop.permute.xlu0 %22 }
  0x81   :  { %24 = vst [vmem:[#allocation5] sm:$0xff] %v23_v1 }
  0x82   :  { %74 = shalt.err (!%p71_p9)
}
  0x83   :  { %34 = dma.vmem_to_hbm [thread:$0]  %s32_s13, 128, %s107_s1, [#allocation4]  }
  0x84   :  { %85 = dma.done.wait [#allocation4], 128  }
  0x85   :  { %86 = vsyncadd [#allocation4], 4294967168 }
  0x86   :  { %38 = vsyncpa [#allocation3], 1 }
  0x87   :  { %39 = vsyncpa [#allocation4], 1 }

</bundles_post_ra>
